<compile_context>
chip_gen: v7x
topology: tpu7x:2x2x1
jax: 0.10.0
libtpu: 0.0.40
codegen_flags: <defaults>
</compile_context>

<pallas_src>
import jax
import jax.numpy as jnp
from jax.experimental import pallas as pl
from jax.experimental.pallas import tpu as pltpu


_LANE = 128      # vreg lane width -> last-dim tile
_SUBLANE = 8     # f32 sublane tile -> second-to-last-dim tile
_MAX_TB = 512    # max batch rows per grid step (>= 2x MXU height on v6e/v7x)


def _round_up(n: int, m: int) -> int:
    return ((n + m - 1) // m) * m


def _mlp_kernel(x_ref, w1_ref, b1_ref, w2_ref, b2_ref, o_ref):
    # Layer 1: (TB, K) @ (K, H) on the MXU — bf16 inputs, f32 accumulation.
    h = jnp.dot(x_ref[...], w1_ref[...], preferred_element_type=jnp.float32)
    # Bias + ReLU in f32 on the VPU (b1 is (1, H) -> broadcasts over rows).
    h = jnp.maximum(h + b1_ref[...], 0.0)
    # Layer 2: cast activations back to bf16 for the MXU, accumulate in f32.
    y = jnp.dot(h.astype(jnp.bfloat16), w2_ref[...],
                preferred_element_type=jnp.float32)
    o_ref[...] = (y + b2_ref[...]).astype(o_ref.dtype)


def simple_mlp_forward(x, w1p, b1p, w2p, b2p, out_dim):
    """Fused 2-layer MLP forward: batch-gridded, lane-padded Pallas call.

    x:   (batch, in_dim) f32 (unpadded)
    w1p: (in_p, hid_p)   bf16 (zero-padded to 128-multiples)
    b1p: (1, hid_p)      f32
    w2p: (hid_p, out_p)  bf16
    b2p: (1, out_p)      f32
    Returns (batch, out_dim) f32.
    """
    batch, in_dim = x.shape
    in_p, hid_p = w1p.shape
    out_p = w2p.shape[1]

    # Batch tile: largest multiple of the sublane tile up to _MAX_TB.
    tb = min(_MAX_TB, _round_up(batch, _SUBLANE))
    batch_p = _round_up(batch, tb)

    # Zero-pad batch & feature dims, cast MXU operand to bf16 (halves DMA).
    x_p = jnp.pad(x.astype(jnp.bfloat16),
                  ((0, batch_p - batch), (0, in_p - in_dim)))

    grid = (batch_p // tb,)
    out = pl.pallas_call(
        _mlp_kernel,
        out_shape=jax.ShapeDtypeStruct((batch_p, out_p), jnp.float32),
        grid=grid,
        in_specs=[
            pl.BlockSpec((tb, in_p), lambda i: (i, 0)),      # x tile (pipelined)
            pl.BlockSpec((in_p, hid_p), lambda i: (0, 0)),   # W1 resident
            pl.BlockSpec((1, hid_p), lambda i: (0, 0)),      # b1 resident
            pl.BlockSpec((hid_p, out_p), lambda i: (0, 0)),  # W2 resident
            pl.BlockSpec((1, out_p), lambda i: (0, 0)),      # b2 resident
        ],
        out_specs=pl.BlockSpec((tb, out_p), lambda i: (i, 0)),
        compiler_params=pltpu.CompilerParams(
            dimension_semantics=("parallel",),
        ),
    )(x_p, w1p, b1p, w2p, b2p)

    # Strip batch / lane padding.
    return out[:batch, :out_dim]


class BaseModelPallas:
    """JAX/Pallas analogue of BaseModel dispatching to the SimpleMLP branch."""

    def __init__(self, model_config: dict, data_config: dict):
        self.model_config = model_config
        self.data_config = data_config
        if model_config["name"] != "SimpleMLP":
            # TODO(synk): SimpleRNN / Seq2Seq not provided in source module.
            raise NotImplementedError(model_config["name"])

        in_dim = data_config["input_dim"]
        hid = model_config["hidden_dim"]
        out_dim = data_config["output_dim"]
        self.in_dim, self.hid, self.out_dim = in_dim, hid, out_dim

        in_p = _round_up(in_dim, _LANE)
        hid_p = _round_up(hid, _LANE)
        out_p = _round_up(out_dim, _LANE)

        # Deterministic parameter init (f32 master copies).
        k1, k2 = jax.random.split(jax.random.PRNGKey(42))
        w1 = (jax.random.normal(k1, (in_dim, hid), jnp.float32)
              * (1.0 / jnp.sqrt(in_dim)))
        w2 = (jax.random.normal(k2, (hid, out_dim), jnp.float32)
              * (1.0 / jnp.sqrt(hid)))
        b1 = jnp.zeros((hid,), jnp.float32)
        b2 = jnp.zeros((out_dim,), jnp.float32)

        # Zero-pad to tile-aligned shapes; matmul operands stored as bf16.
        self.w1 = jnp.pad(w1, ((0, in_p - in_dim), (0, hid_p - hid))
                          ).astype(jnp.bfloat16)
        self.w2 = jnp.pad(w2, ((0, hid_p - hid), (0, out_p - out_dim))
                          ).astype(jnp.bfloat16)
        self.b1 = jnp.pad(b1, (0, hid_p - hid)).reshape(1, hid_p)   # f32
        self.b2 = jnp.pad(b2, (0, out_p - out_dim)).reshape(1, out_p)  # f32

    def __call__(self, x):
        return simple_mlp_forward(x, self.w1, self.b1, self.w2, self.b2,
                                  self.out_dim)


def _reference(model: BaseModelPallas, x):
    """Pure-JAX reference on the (unpadded) bf16-rounded weights."""
    w1 = model.w1[: model.in_dim, : model.hid].astype(jnp.float32)
    w2 = model.w2[: model.hid, : model.out_dim].astype(jnp.float32)
    b1 = model.b1[:, : model.hid]
    b2 = model.b2[:, : model.out_dim]
    h = jnp.maximum(x @ w1 + b1, 0.0)
    return h @ w2 + b2


if __name__ == "__main__":
    model_config = {"name": "SimpleMLP", "device": "tpu", "hidden_dim": 64}
    data_config = {"input_dim": 32, "output_dim": 16}

    model = BaseModelPallas(model_config, data_config)

    key = jax.random.PRNGKey(0)
    batch = 8
    x = jax.random.normal(key, (batch, data_config["input_dim"]), jnp.float32)

    y = model(x)
    y = jax.block_until_ready(y)

    y_ref = _reference(model, x)
    assert y.shape == (batch, data_config["output_dim"])
    # bf16 MXU inputs (x / h) -> ~1e-2 relative error vs. f32 reference.
    assert jnp.allclose(y, y_ref, atol=2e-2, rtol=2e-2), (
        float(jnp.max(jnp.abs(y - y_ref))))

    print("KERNEL_OK")
</pallas_src>

<mosaic_0001>
module attributes {stable_mosaic.version = 11 : i64} {
  func.func @_mlp_kernel(%arg0: i32, %arg1: memref<8x128xbf16, #tpu.memory_space<vmem>>, %arg2: memref<128x128xbf16, #tpu.memory_space<vmem>>, %arg3: memref<1x128xf32, #tpu.memory_space<vmem>>, %arg4: memref<128x128xbf16, #tpu.memory_space<vmem>>, %arg5: memref<1x128xf32, #tpu.memory_space<vmem>>, %arg6: memref<8x128xf32, #tpu.memory_space<vmem>>) attributes {dimension_semantics = [#tpu.dimension_semantics<parallel>], iteration_bounds = array<i64: 1>, scalar_prefetch = 0 : i64, scratch_operands = 0 : i64, tpu.core_type = #tpu.core_type<tc>, window_params = [{transform_indices = @transform_0, window_bounds = array<i64: 8, 128>}, {pipeline_mode = #tpu.pipeline_mode<synchronous>, transform_indices = @transform_1, window_bounds = array<i64: 128, 128>}, {pipeline_mode = #tpu.pipeline_mode<synchronous>, transform_indices = @transform_2, window_bounds = array<i64: 1, 128>}, {pipeline_mode = #tpu.pipeline_mode<synchronous>, transform_indices = @transform_3, window_bounds = array<i64: 128, 128>}, {pipeline_mode = #tpu.pipeline_mode<synchronous>, transform_indices = @transform_4, window_bounds = array<i64: 1, 128>}, {transform_indices = @transform_5, window_bounds = array<i64: 8, 128>}]} {
    %c0 = arith.constant 0 : index
    %c0_0 = arith.constant 0 : index
    %0 = vector.load %arg1[%c0, %c0_0] : memref<8x128xbf16, #tpu.memory_space<vmem>>, vector<8x128xbf16>
    %c0_1 = arith.constant 0 : index
    %c0_2 = arith.constant 0 : index
    %1 = vector.load %arg2[%c0_1, %c0_2] : memref<128x128xbf16, #tpu.memory_space<vmem>>, vector<128x128xbf16>
    %cst = arith.constant dense<0.000000e+00> : vector<8x128xf32>
    %2 = tpu.matmul %0, %1, %cst {dimension_numbers = #tpu.dot_dimension_numbers<[1], [0], [0], [1], [0, 0, 1, 1], [], []>} : vector<8x128xbf16>, vector<128x128xbf16>, vector<8x128xf32> -> vector<8x128xf32>
    %c0_3 = arith.constant 0 : index
    %c0_4 = arith.constant 0 : index
    %3 = vector.load %arg3[%c0_3, %c0_4] : memref<1x128xf32, #tpu.memory_space<vmem>>, vector<1x128xf32>
    %4 = vector.broadcast %3 : vector<1x128xf32> to vector<8x128xf32>
    %5 = arith.addf %2, %4 : vector<8x128xf32>
    %cst_5 = arith.constant 0.000000e+00 : f32
    %6 = vector.broadcast %cst_5 : f32 to vector<8x128xf32>
    %7 = arith.maximumf %5, %6 : vector<8x128xf32>
    %8 = arith.truncf %7 : vector<8x128xf32> to vector<8x128xbf16>
    %c0_6 = arith.constant 0 : index
    %c0_7 = arith.constant 0 : index
    %9 = vector.load %arg4[%c0_6, %c0_7] : memref<128x128xbf16, #tpu.memory_space<vmem>>, vector<128x128xbf16>
    %cst_8 = arith.constant dense<0.000000e+00> : vector<8x128xf32>
    %10 = tpu.matmul %8, %9, %cst_8 {dimension_numbers = #tpu.dot_dimension_numbers<[1], [0], [0], [1], [0, 0, 1, 1], [], []>} : vector<8x128xbf16>, vector<128x128xbf16>, vector<8x128xf32> -> vector<8x128xf32>
    %c0_9 = arith.constant 0 : index
    %c0_10 = arith.constant 0 : index
    %11 = vector.load %arg5[%c0_9, %c0_10] : memref<1x128xf32, #tpu.memory_space<vmem>>, vector<1x128xf32>
    %12 = vector.broadcast %11 : vector<1x128xf32> to vector<8x128xf32>
    %13 = arith.addf %10, %12 : vector<8x128xf32>
    %c0_11 = arith.constant 0 : index
    %c0_12 = arith.constant 0 : index
    %14 = vector.load %arg6[%c0_11, %c0_12] : memref<8x128xf32, #tpu.memory_space<vmem>>, vector<8x128xf32>
    tpu.vector_store %arg6[%c0_11, %c0_12], %13 {strides = array<i32>} : memref<8x128xf32, #tpu.memory_space<vmem>>, vector<8x128xf32>,
    return
  }
  func.func @transform_0(%arg0: i32) -> (i32, i32) {
    %c0_i32 = arith.constant 0 : i32
    %c0_i32_0 = arith.constant 0 : i32
    return %arg0, %c0_i32 : i32, i32
  }
  func.func @transform_1(%arg0: i32) -> (i32, i32) {
    %c0_i32 = arith.constant 0 : i32
    %c0_i32_0 = arith.constant 0 : i32
    %c0_i32_1 = arith.constant 0 : i32
    return %c0_i32, %c0_i32_0 : i32, i32
  }
  func.func @transform_2(%arg0: i32) -> (i32, i32) {
    %c0_i32 = arith.constant 0 : i32
    %c0_i32_0 = arith.constant 0 : i32
    %c0_i32_1 = arith.constant 0 : i32
    return %c0_i32, %c0_i32_0 : i32, i32
  }
  func.func @transform_3(%arg0: i32) -> (i32, i32) {
    %c0_i32 = arith.constant 0 : i32
    %c0_i32_0 = arith.constant 0 : i32
    %c0_i32_1 = arith.constant 0 : i32
    return %c0_i32, %c0_i32_0 : i32, i32
  }
  func.func @transform_4(%arg0: i32) -> (i32, i32) {
    %c0_i32 = arith.constant 0 : i32
    %c0_i32_0 = arith.constant 0 : i32
    %c0_i32_1 = arith.constant 0 : i32
    return %c0_i32, %c0_i32_0 : i32, i32
  }
  func.func @transform_5(%arg0: i32) -> (i32, i32) {
    %c0_i32 = arith.constant 0 : i32
    %c0_i32_0 = arith.constant 0 : i32
    return %arg0, %c0_i32 : i32, i32
  }
}

</mosaic_0001>

<bundles_post_ra>
// kernel: tpu_custom_call.1
= control target key start
LH: loop header
LB: loop body
LE: loop exit
PB: predicated region body
PF: predicated region fallthrough
CT: control target
= control target key end

     0   :  { %10 = vsyncpa [#allocation3], 0  ;;  %s595_s0 = inlined_call_operand.hbm [shape: bf16[8,128], index: 0, kind: input, shape index: {}]   ;;  %s596_s1 = inlined_call_operand.hbm [shape: bf16[128,128], index: 1, kind: input, shape index: {}]   ;;  %s597_s2 = inlined_call_operand.vmem [shape: f32[1,128], index: 2, kind: input, shape index: {}]   ;;  %s598_s3 = inlined_call_operand.hbm [shape: bf16[128,128], index: 3, kind: input, shape index: {}]   ;;  %s599_s4 = inlined_call_operand.vmem [shape: f32[1,128], index: 4, kind: input, shape index: {}]   ;;  %s600_s5 = inlined_call_operand.hbm [shape: f32[8,128], index: 5, kind: output, shape index: {}]  }
   0x1   :  { %11 = vsyncpa [#allocation6], 0 }
   0x2   :  { %12 = vsyncpa [#allocation4], 0  ;;  %s497_s18 = smov [#allocation5]   ;;  %s403_s22 = scalar_lea.hbm %s596_s1, 1024 }
   0x3   :  { %s28_s19 = sshll.u32 %s497_s18, 4  ;;  %p404_p0 = scmp.ne.s32.totalorder %s596_s1, %s403_s22  ;;  %s29_s19 = int_to_ptr.vmem [resolvable:$true] %s28_s19 }
   0x4   :  { %p407_p1 = scmp.lt.u32.totalorder %s403_s22, %s596_s1 }
   0x6   :  { %p409_p2 = pnand %p407_p1, %p404_p0 }
   0x8   :  { %412 = shalt.err (!%p409_p2)
}
   0x9   :  { %s413_s27 = scalar_lea.vmem %s29_s19, 1024  ;;  %p418_p4 = scmp.lt.s32.totalorder %s29_s19, %s29_s19 }
   0xa   :  { %p414_p3 = scmp.ne.s32.totalorder %s29_s19, %s413_s27  ;;  %p419_p5 = scmp.lt.s32.totalorder %s413_s27, %s413_s27 }
   0xc   :  { %p420_p6 = por %p419_p5, %p418_p4 }
   0xe   :  { %p421_p7 = pnand %p420_p6, %p414_p3 }
  0x10   :  { %424 = shalt.err (!%p421_p7)
}
  0x11   :  { %s498_s28 = smov 64   ;;  %s499_s29 = smov 4  }
  0x12   :  { %34 = dma.hbm_to_vmem [thread:$0]  %s596_s1, 1024, %s29_s19, [#allocation6], %s498_s28, %s498_s28, %s499_s29  }
  0x13   :  { %s500_s7 = smov [#allocation2]   ;;  %s501_s9 = smov [#allocation7]  }
  0x14   :  { %s19_s8 = sshll.u32 %s500_s7, 4  ;;  %s42_s10 = sshll.u32 %s501_s9, 4  ;;  %s20_s8 = int_to_ptr.vmem [resolvable:$true] %s19_s8  ;;  %s43_s10 = int_to_ptr.vmem [resolvable:$true] %s42_s10 }
  0x15   :  { %s425_s13 = scalar_lea.hbm %s595_s0, 64 }
  0x16   :  { %p426_p8 = scmp.ne.s32.totalorder %s595_s0, %s425_s13  ;;  %p429_p9 = scmp.lt.u32.totalorder %s425_s13, %s595_s0 }
  0x18   :  { %p431_p10 = pnand %p429_p9, %p426_p8 }
  0x1a   :  { %434 = shalt.err (!%p431_p10)
}
  0x1b   :  { %s435_s1 = scalar_lea.vmem %s20_s8, 64  ;;  %p440_p12 = scmp.lt.s32.totalorder %s20_s8, %s20_s8 }
  0x1c   :  { %p436_p11 = scmp.ne.s32.totalorder %s20_s8, %s435_s1  ;;  %p441_p13 = scmp.lt.s32.totalorder %s435_s1, %s435_s1 }
  0x1e   :  { %p442_p0 = por %p441_p13, %p440_p12 }
  0x20   :  { %p443_p1 = pnand %p442_p0, %p436_p11 }
  0x22   :  { %446 = shalt.err (!%p443_p1)
}
  0x23   :  { %22 = dma.hbm_to_vmem [thread:$0]  %s595_s0, 64, %s20_s8, [#allocation3]  }
  0x24   :  { %s447_s22 = scalar_lea.hbm %s598_s3, 1024 }
  0x25   :  { %p448_p2 = scmp.ne.s32.totalorder %s598_s3, %s447_s22  ;;  %p451_p3 = scmp.lt.u32.totalorder %s447_s22, %s598_s3 }
  0x27   :  { %p453_p4 = pnand %p451_p3, %p448_p2 }
  0x29   :  { %456 = shalt.err (!%p453_p4)
}
  0x2a   :  { %s457_s27 = scalar_lea.vmem %s43_s10, 1024  ;;  %p462_p6 = scmp.lt.s32.totalorder %s43_s10, %s43_s10 }
  0x2b   :  { %p458_p5 = scmp.ne.s32.totalorder %s43_s10, %s457_s27  ;;  %p463_p7 = scmp.lt.s32.totalorder %s457_s27, %s457_s27 }
  0x2d   :  { %p464_p8 = por %p463_p7, %p462_p6 }
  0x2f   :  { %p465_p9 = pnand %p464_p8, %p458_p5 }
  0x31   :  { %468 = shalt.err (!%p465_p9)
}
  0x32   :  { %48 = dma.hbm_to_vmem [thread:$0]  %s598_s3, 1024, %s43_s10, [#allocation6], %s498_s28, %s498_s28, %s499_s29  }
  0x33   :  { %491 = dma.done.wait [#allocation3], 64  }
  0x34   :  { %492 = vsyncadd [#allocation3], 4294967232 }
  0x35   :  { %493 = dma.done.wait [#allocation6], 2048  }
  0x36   :  { %494 = vsyncadd [#allocation6], 4294965248  ;;  %v502_v0 = vmov 0.0   ;;  %vm503_vm0 = vmmov 0   ;;  %v387_v1 = vld [vmem:[#allocation5] sm:$0xff]   ;;  %v388_v2 = vld [vmem:[#allocation5 + $0x8] sm:$0xff]  }
  0x37   :  { %339 = vmatprep.subr.bf16.mxu0 %v502_v0  ;;  %355 = vmatprep.mubr.msk.bf16.mxu0 %vm503_vm0, %v502_v0  ;;  %v389_v3 = vld [vmem:[#allocation5 + $0x10] sm:$0xff]   ;;  %v395_v4 = vld [vmem:[#allocation7] sm:$0xff]   ;;  %v390_v5 = vld [vmem:[#allocation5 + $0x18] sm:$0xff]   ;;  %s504_s7 = smov [#allocation8]  }
  0x38   :  { %359 = vmatprep.subr.bf16.mxu1 %v502_v0  ;;  %375 = vmatprep.mubr.msk.bf16.mxu1 %vm503_vm0, %v502_v0  ;;  %v396_v6 = vld [vmem:[#allocation7 + $0x8] sm:$0xff]   ;;  %v391_v7 = vld [vmem:[#allocation5 + $0x20] sm:$0xff]   ;;  %v397_v8 = vld [vmem:[#allocation7 + $0x10] sm:$0xff]   ;;  %s293_s8 = sshll.u32 %s504_s7, 4  ;;  %s294_s8 = int_to_ptr.vmem [resolvable:$true] %s293_s8 }
  0x39   :  { %340 = vmatpush3.bf16.msra.mxu0 %v387_v1  ;;  %360 = vmatpush3.bf16.msra.mxu1 %v395_v4  ;;  %v392_v9 = vld [vmem:[#allocation5 + $0x28] sm:$0xff]   ;;  %v398_v10 = vld [vmem:[#allocation7 + $0x18] sm:$0xff]   ;;  %v393_v11 = vld [vmem:[#allocation5 + $0x30] sm:$0xff]   ;;  %p474_p11 = scmp.lt.s32.totalorder %s294_s8, %s294_s8 }
  0x3a   :  { %341 = vmatprep.subr.bf16.mxu0 %v502_v0  ;;  %361 = vmatprep.subr.bf16.mxu1 %v502_v0  ;;  %v399_v12 = vld [vmem:[#allocation7 + $0x20] sm:$0xff]   ;;  %v394_v13 = vld [vmem:[#allocation5 + $0x38] sm:$0xff]   ;;  %v400_v14 = vld [vmem:[#allocation7 + $0x28] sm:$0xff]  }
  0x3b   :  { %v61_v15 = vld [vmem:[#allocation2] sm:$0xf]  ;;  %v401_v16 = vld [vmem:[#allocation7 + $0x30] sm:$0xff]  }
  0x3c   :  { %v402_v17 = vld [vmem:[#allocation7 + $0x38] sm:$0xff]  }
  0x3d   :  { %342 = vmatpush3.bf16.msra.mxu0 %v388_v2  ;;  %362 = vmatpush3.bf16.msra.mxu1 %v396_v6  ;;  %v303_v18 = vld [vmem:[%s597_s2] ss:$0 sm:$0xff]  ;;  %s469_s2 = scalar_lea.vmem %s294_s8, 128 }
  0x3e   :  { %343 = vmatprep.subr.bf16.mxu0 %v502_v0  ;;  %363 = vmatprep.subr.bf16.mxu1 %v502_v0  ;;  %v312_v26 = vld [vmem:[%s599_s4] ss:$0 sm:$0xff]  ;;  %p470_p10 = scmp.ne.s32.totalorder %s294_s8, %s469_s2  ;;  %p475_p12 = scmp.lt.s32.totalorder %s469_s2, %s469_s2 }
  0x40   :  { %p476_p13 = por %p475_p12, %p474_p11 }
  0x41   :  { %344 = vmatpush3.bf16.msra.mxu0 %v389_v3  ;;  %364 = vmatpush3.bf16.msra.mxu1 %v397_v8 }
  0x42   :  { %345 = vmatprep.subr.bf16.mxu0 %v502_v0  ;;  %365 = vmatprep.subr.bf16.mxu1 %v502_v0  ;;  %p477_p0 = pnand %p476_p13, %p470_p10 }
  0x45   :  { %346 = vmatpush3.bf16.msra.mxu0 %v390_v5  ;;  %366 = vmatpush3.bf16.msra.mxu1 %v398_v10 }
  0x46   :  { %347 = vmatprep.subr.bf16.mxu0 %v502_v0  ;;  %367 = vmatprep.subr.bf16.mxu1 %v502_v0 }
  0x49   :  { %348 = vmatpush3.bf16.msra.mxu0 %v391_v7  ;;  %368 = vmatpush3.bf16.msra.mxu1 %v399_v12 }
  0x4a   :  { %349 = vmatprep.subr.bf16.mxu0 %v502_v0  ;;  %369 = vmatprep.subr.bf16.mxu1 %v502_v0 }
  0x4d   :  { %350 = vmatpush3.bf16.msra.mxu0 %v392_v9  ;;  %370 = vmatpush3.bf16.msra.mxu1 %v400_v14 }
  0x4e   :  { %351 = vmatprep.subr.bf16.mxu0 %v502_v0  ;;  %371 = vmatprep.subr.bf16.mxu1 %v502_v0 }
  0x51   :  { %352 = vmatpush3.bf16.msra.mxu0 %v393_v11  ;;  %372 = vmatpush3.bf16.msra.mxu1 %v401_v16 }
  0x52   :  { %353 = vmatprep.subr.bf16.mxu0 %v502_v0  ;;  %373 = vmatprep.subr.bf16.mxu1 %v502_v0 }
  0x55   :  { %354 = vmatpush3.bf16.msra.mxu0 %v394_v13  ;;  %374 = vmatpush3.bf16.msra.mxu1 %v402_v17 }
  0x58   :  { %356 = vmatmul.mubr.bf16.vlgmr.msra.gmra.mrb[0].mxu0 %v61_v15 }
 0x12b   :  { %v167_v19 = vpop.f32.mrb[0].mxu0 }
 0x12c   :  { %v168_v20 = vadd.f32 %v303_v18, %v167_v19  ;;  %v357_v21 = vpop.f32.mrb[1].mxu0 }
 0x12d   :  { %v170_v22 = vpop.f32.mrb[2].mxu0 }
 0x12e   :  { %v173_v23 = vmax.f32 %v168_v20, 0.0  ;;  %v358_v24 = vpop.f32.mrb[3].mxu0 }
 0x130   :  { %v174_v25 = vpack.c.bf16 %v173_v23, %v173_v23 }
 0x132   :  { %376 = vmatmul.mubr.bf16.vlgmr.msra.gmra.mrb[0].mxu1 %v174_v25 }
 0x205   :  { %v280_v27 = vpop.f32.mrb[0].mxu1 }
 0x206   :  { %v281_v28 = vadd.f32 %v312_v26, %v280_v27  ;;  %v377_v29 = vpop.f32.mrb[1].mxu1 }
 0x207   :  { %v283_v30 = vpop.f32.mrb[2].mxu1 }
 0x208   :  { %286 = vst [vmem:[#allocation8] sm:$0xff] %v281_v28  ;;  %v378_v31 = vpop.f32.mrb[3].mxu1 }
 0x209   :  { %480 = shalt.err (!%p477_p0)
}
 0x20a   :  { %s481_s4 = scalar_lea.hbm %s600_s5, 128 }
 0x20b   :  { %p482_p1 = scmp.ne.s32.totalorder %s600_s5, %s481_s4  ;;  %p485_p2 = scmp.lt.u32.totalorder %s481_s4, %s600_s5 }
 0x20d   :  { %p487_p3 = pnand %p485_p2, %p482_p1 }
 0x20f   :  { %490 = shalt.err (!%p487_p3)
}
 0x210   :  { %296 = dma.vmem_to_hbm [thread:$0]  %s294_s8, 128, %s600_s5, [#allocation4]  }
 0x211   :  { %495 = dma.done.wait [#allocation4], 128  }
 0x212   :  { %496 = vsyncadd [#allocation4], 4294967168 }
 0x213   :  { %300 = vsyncpa [#allocation3], 1 }
 0x214   :  { %301 = vsyncpa [#allocation6], 1 }
 0x215   :  { %302 = vsyncpa [#allocation4], 1 }

</bundles_post_ra>
